<compile_context>
chip_gen: v6e
topology: v6e:2x2x1
jax: 0.10.0
libtpu: 0.0.40
codegen_flags: <defaults>
</compile_context>

<pallas_src>
import functools

import jax
import jax.numpy as jnp
from jax.experimental import pallas as pl
from jax.experimental.pallas import tpu as pltpu


def _round_up(n, m):
    return (n + m - 1) // m * m


def _slalom_kernel(x_ref, toks_ref, vals_ref, imp_ref, out_ref,
                   m_ref, den_ref, num_ref, *,
                   n_tok, seq_len, seq_block, seq_masked):
    """Fused token lookup + online softmax over the sequence + weighted sum."""
    j = pl.program_id(1)

    # ---- init running max / denominator / numerator at the first seq block.
    @pl.when(j == 0)
    def _():
        m_ref[...] = jnp.full_like(m_ref, -jnp.inf)
        den_ref[...] = jnp.zeros_like(den_ref)
        num_ref[...] = jnp.zeros_like(num_ref)

    x = x_ref[...]                                       # (TB, TL) int32 token ids
    tb, tl = x.shape

    # Fused token-id -> (value, importance) lookup.  Slot 0 ("not one of my
    # tokens") is the default; each modelled token k overrides it, mirroring
    # indexer[my_tokens[k]] = k + 1 (duplicates resolve last-wins, like the
    # PyTorch indexer assignment).  Tables are scalar reads from SMEM.
    tok_vals = jnp.full((tb, tl), vals_ref[0], dtype=jnp.float32)
    tok_imp = jnp.full((tb, tl), imp_ref[0], dtype=jnp.float32)
    for k in range(n_tok):
        match = x == toks_ref[k]
        tok_vals = jnp.where(match, vals_ref[k + 1], tok_vals)
        tok_imp = jnp.where(match, imp_ref[k + 1], tok_imp)

    # Mask padded tail columns (only emitted when the sequence was padded).
    if seq_masked:
        col = j * seq_block + jax.lax.broadcasted_iota(jnp.int32, (tb, tl), 1)
        tok_imp = jnp.where(col < seq_len, tok_imp, -jnp.inf)

    # ---- online-softmax update over this sequence block.
    m_prev = m_ref[...]                                  # (TB, 1)
    m_new = jnp.maximum(m_prev, jnp.max(tok_imp, axis=1, keepdims=True))
    alpha = jnp.exp(m_prev - m_new)                      # rescale old partials
    p = jnp.exp(tok_imp - m_new)                         # (TB, TL)
    den_ref[...] = alpha * den_ref[...] + jnp.sum(p, axis=1, keepdims=True)
    num_ref[...] = alpha * num_ref[...] + jnp.sum(p * tok_vals, axis=1,
                                                  keepdims=True)
    m_ref[...] = m_new

    # ---- finalize on the last seq block: single full-tile store,
    # column 0 = zeros, column 1 = SLALOM score.
    @pl.when(j == pl.num_programs(1) - 1)
    def _():
        res = num_ref[...] * pl.reciprocal(den_ref[...], approx=True)
        out_col = jax.lax.broadcasted_iota(jnp.int32, (tb, 2), 1)
        out_ref[...] = jnp.where(out_col == 1, res, 0.0)


def slalom_forward(x, my_tokens, my_values, my_importance, *,
                   block_b=256, block_l=1024):
    """Pallas-backed equivalent of MyLittleSLALOM.forward.

    x: (B, L) integer token ids.  my_tokens: (n_tok,) modelled token ids.
    my_values / my_importance: (n_tok + 1,) parameter tables (slot 0 = other).
    Returns (B, 2) float32: column 0 zeros, column 1 the SLALOM score.
    """
    x = x.astype(jnp.int32)
    B, L = x.shape
    n_tok = int(my_tokens.shape[0])

    # Batch tiling: rows per block must be a multiple of 8 (sublanes).  Pad
    # rows hit slot 0 and are sliced off afterwards.
    tb = min(_round_up(block_b, 8), _round_up(B, 8))
    b_pad = _round_up(B, tb)

    # Sequence tiling: short sequences take one full-width block (no padding);
    # long sequences are chunked into 128-multiple blocks with an online
    # softmax carry, keeping double-buffered blocks well inside v7x VMEM.
    if L <= block_l:
        tl, l_pad, seq_masked = L, L, False
    else:
        tl = _round_up(block_l, 128)
        l_pad = _round_up(L, tl)
        seq_masked = l_pad != L

    if (b_pad != B) or (l_pad != L):
        x = jnp.pad(x, ((0, b_pad - B), (0, l_pad - L)))

    kernel = functools.partial(_slalom_kernel, n_tok=n_tok, seq_len=L,
                               seq_block=tl, seq_masked=seq_masked)
    out = pl.pallas_call(
        kernel,
        out_shape=jax.ShapeDtypeStruct((b_pad, 2), jnp.float32),
        grid=(b_pad // tb, l_pad // tl),
        in_specs=[
            pl.BlockSpec((tb, tl), lambda i, j: (i, j)),          # token ids
            pl.BlockSpec(memory_space=pltpu.MemorySpace.SMEM),    # my_tokens
            pl.BlockSpec(memory_space=pltpu.MemorySpace.SMEM),    # my_values
            pl.BlockSpec(memory_space=pltpu.MemorySpace.SMEM),    # my_importance
        ],
        out_specs=pl.BlockSpec((tb, 2), lambda i, j: (i, 0)),     # resident over j
        scratch_shapes=[pltpu.VMEM((tb, 1), jnp.float32),         # running max
                        pltpu.VMEM((tb, 1), jnp.float32),         # running denom
                        pltpu.VMEM((tb, 1), jnp.float32)],        # running numer
        compiler_params=pltpu.CompilerParams(
            dimension_semantics=("parallel", "arbitrary")),
    )(x, my_tokens.astype(jnp.int32), my_values.astype(jnp.float32),
      my_importance.astype(jnp.float32))
    return out[:B]


def slalom_ref(x, indexer, my_values, my_importance):
    """Pure-JAX reference mirroring the PyTorch forward."""
    idx = indexer[x]
    tv = my_values[idx]
    ti = my_importance[idx]
    w = jax.nn.softmax(ti, axis=-1)
    out = jnp.sum(w * tv, axis=1)
    return jnp.stack([jnp.zeros(x.shape[0], jnp.float32), out], axis=1)


if __name__ == "__main__":
    key = jax.random.PRNGKey(0)
    k_v, k_s, k_x = jax.random.split(key, 3)

    # ---- deterministic parameter construction (mirrors __init__ + set_parameters)
    my_tokens = jnp.array([3, 7, 11, 19, 42, 57], dtype=jnp.int32)
    pad_token_id = 0
    n_tok = int(my_tokens.shape[0])
    vocab_size = int(max(pad_token_id, int(jnp.max(my_tokens)))) + 1

    # indexer is only needed by the pure-JAX reference; the kernel fuses the lookup.
    indexer = jnp.zeros((vocab_size,), dtype=jnp.int32)
    indexer = indexer.at[my_tokens].set(jnp.arange(n_tok, dtype=jnp.int32) + 1)

    my_importance = jnp.zeros((n_tok + 1,), dtype=jnp.float32)
    my_importance = my_importance.at[0].set(jnp.finfo(jnp.float32).min)  # slot 0 = "other"
    my_values = jnp.zeros((n_tok + 1,), dtype=jnp.float32)               # v_init = 0.0

    # set_parameters(v, s) with deterministic random v, s
    v = jax.random.normal(k_v, (n_tok,), dtype=jnp.float32)
    s = jax.random.normal(k_s, (n_tok,), dtype=jnp.float32)
    my_values = my_values.at[1:].set(v)
    my_importance = my_importance.at[1:].set(s)

    # ---- case 1: small (B, L), mix of known / unknown tokens.
    B, L = 2, 8
    x = jax.random.randint(k_x, (B, L), 0, vocab_size, dtype=jnp.int32)
    x = x.at[:, 0].set(7)
    x = x.at[:, 3].set(42)
    x = x.at[1, 5].set(11)
    out = jax.block_until_ready(slalom_forward(x, my_tokens, my_values, my_importance))
    ref = slalom_ref(x, indexer, my_values, my_importance)
    assert out.shape == (B, 2) and out.dtype == jnp.float32
    assert jnp.allclose(out, ref, atol=2e-3, rtol=2e-3), (out, ref)

    # ---- case 2: batch padding + multiple batch-grid blocks.
    B2, L2 = 20, 16
    x2 = jax.random.randint(jax.random.PRNGKey(1), (B2, L2), 0, vocab_size,
                            dtype=jnp.int32)
    out2 = jax.block_until_ready(
        slalom_forward(x2, my_tokens, my_values, my_importance, block_b=8))
    ref2 = slalom_ref(x2, indexer, my_values, my_importance)
    assert jnp.allclose(out2, ref2, atol=2e-3, rtol=2e-3), (out2, ref2)

    # ---- case 3: long sequence -> online-softmax path (seq grid + tail masking).
    B3, L3 = 4, 300
    x3 = jax.random.randint(jax.random.PRNGKey(2), (B3, L3), 0, vocab_size,
                            dtype=jnp.int32)
    x3 = x3.at[:, 1].set(3)
    x3 = x3.at[:, 200].set(57)
    x3 = x3.at[2, 299].set(19)
    out3 = jax.block_until_ready(
        slalom_forward(x3, my_tokens, my_values, my_importance,
                       block_b=8, block_l=128))
    ref3 = slalom_ref(x3, indexer, my_values, my_importance)
    assert jnp.allclose(out3, ref3, atol=2e-3, rtol=2e-3), (out3, ref3)

    print("KERNEL_OK")
</pallas_src>

<mosaic_0001>
module attributes {stable_mosaic.version = 11 : i64} {
  func.func @_slalom_kernel(%arg0: i32, %arg1: i32, %arg2: memref<8x8xi32, #tpu.memory_space<vmem>>, %arg3: memref<6xi32, #tpu.memory_space<smem>>, %arg4: memref<7xf32, #tpu.memory_space<smem>>, %arg5: memref<7xf32, #tpu.memory_space<smem>>, %arg6: memref<8x2xf32, #tpu.memory_space<vmem>>, %arg7: memref<8x1xf32, #tpu.memory_space<vmem>>, %arg8: memref<8x1xf32, #tpu.memory_space<vmem>>, %arg9: memref<8x1xf32, #tpu.memory_space<vmem>>) attributes {dimension_semantics = [#tpu.dimension_semantics<parallel>, #tpu.dimension_semantics<arbitrary>], iteration_bounds = array<i64: 1, 1>, scalar_prefetch = 0 : i64, scratch_operands = 3 : i64, tpu.core_type = #tpu.core_type<tc>, window_params = [{transform_indices = @transform_0, window_bounds = array<i64: 8, 8>}, {transform_indices = @transform_1, window_bounds = array<i64: 6>}, {transform_indices = @transform_2, window_bounds = array<i64: 7>}, {transform_indices = @transform_3, window_bounds = array<i64: 7>}, {transform_indices = @transform_4, window_bounds = array<i64: 8, 2>}]} {
    %c0_i32 = arith.constant 0 : i32
    %0 = arith.cmpi eq, %arg1, %c0_i32 : i32
    %1 = arith.extui %0 : i1 to i32
    %c0_i32_0 = arith.constant 0 : i32
    %2 = arith.cmpi ne, %1, %c0_i32_0 : i32
    scf.if %2 {
      %cst_32 = arith.constant 0xFF800000 : f32
      %88 = vector.broadcast %cst_32 : f32 to vector<8x1xf32>
      %c0_33 = arith.constant 0 : index
      %c0_34 = arith.constant 0 : index
      %89 = vector.load %arg7[%c0_33, %c0_34] : memref<8x1xf32, #tpu.memory_space<vmem>>, vector<8x1xf32>
      tpu.vector_store %arg7[%c0_33, %c0_34], %88 {strides = array<i32>} : memref<8x1xf32, #tpu.memory_space<vmem>>, vector<8x1xf32>,
      %cst_35 = arith.constant 0.000000e+00 : f32
      %90 = vector.broadcast %cst_35 : f32 to vector<8x1xf32>
      %c0_36 = arith.constant 0 : index
      %c0_37 = arith.constant 0 : index
      %91 = vector.load %arg8[%c0_36, %c0_37] : memref<8x1xf32, #tpu.memory_space<vmem>>, vector<8x1xf32>
      tpu.vector_store %arg8[%c0_36, %c0_37], %90 {strides = array<i32>} : memref<8x1xf32, #tpu.memory_space<vmem>>, vector<8x1xf32>,
      %cst_38 = arith.constant 0.000000e+00 : f32
      %92 = vector.broadcast %cst_38 : f32 to vector<8x1xf32>
      %c0_39 = arith.constant 0 : index
      %c0_40 = arith.constant 0 : index
      %93 = vector.load %arg9[%c0_39, %c0_40] : memref<8x1xf32, #tpu.memory_space<vmem>>, vector<8x1xf32>
      tpu.vector_store %arg9[%c0_39, %c0_40], %92 {strides = array<i32>} : memref<8x1xf32, #tpu.memory_space<vmem>>, vector<8x1xf32>,
    } else {
    }
    %c0 = arith.constant 0 : index
    %c0_1 = arith.constant 0 : index
    %3 = vector.load %arg2[%c0, %c0_1] : memref<8x8xi32, #tpu.memory_space<vmem>>, vector<8x8xi32>
    %c0_2 = arith.constant 0 : index
    %4 = memref.load %arg4[%c0_2] : memref<7xf32, #tpu.memory_space<smem>>
    %5 = vector.broadcast %4 : f32 to vector<8x8xf32>
    %c0_3 = arith.constant 0 : index
    %6 = memref.load %arg5[%c0_3] : memref<7xf32, #tpu.memory_space<smem>>
    %7 = vector.broadcast %6 : f32 to vector<8x8xf32>
    %c0_4 = arith.constant 0 : index
    %8 = memref.load %arg3[%c0_4] : memref<6xi32, #tpu.memory_space<smem>>
    %9 = vector.broadcast %8 : i32 to vector<8x8xi32>
    %10 = arith.cmpi eq, %3, %9 : vector<8x8xi32>
    %c1 = arith.constant 1 : index
    %11 = memref.load %arg4[%c1] : memref<7xf32, #tpu.memory_space<smem>>
    %12 = vector.broadcast %11 : f32 to vector<8x8xf32>
    %13 = arith.select %10, %12, %5 : vector<8x8xi1>, vector<8x8xf32>
    %c1_5 = arith.constant 1 : index
    %14 = memref.load %arg5[%c1_5] : memref<7xf32, #tpu.memory_space<smem>>
    %15 = vector.broadcast %14 : f32 to vector<8x8xf32>
    %16 = arith.select %10, %15, %7 : vector<8x8xi1>, vector<8x8xf32>
    %c1_6 = arith.constant 1 : index
    %17 = memref.load %arg3[%c1_6] : memref<6xi32, #tpu.memory_space<smem>>
    %18 = vector.broadcast %17 : i32 to vector<8x8xi32>
    %19 = arith.cmpi eq, %3, %18 : vector<8x8xi32>
    %c2 = arith.constant 2 : index
    %20 = memref.load %arg4[%c2] : memref<7xf32, #tpu.memory_space<smem>>
    %21 = vector.broadcast %20 : f32 to vector<8x8xf32>
    %22 = arith.select %19, %21, %13 : vector<8x8xi1>, vector<8x8xf32>
    %c2_7 = arith.constant 2 : index
    %23 = memref.load %arg5[%c2_7] : memref<7xf32, #tpu.memory_space<smem>>
    %24 = vector.broadcast %23 : f32 to vector<8x8xf32>
    %25 = arith.select %19, %24, %16 : vector<8x8xi1>, vector<8x8xf32>
    %c2_8 = arith.constant 2 : index
    %26 = memref.load %arg3[%c2_8] : memref<6xi32, #tpu.memory_space<smem>>
    %27 = vector.broadcast %26 : i32 to vector<8x8xi32>
    %28 = arith.cmpi eq, %3, %27 : vector<8x8xi32>
    %c3 = arith.constant 3 : index
    %29 = memref.load %arg4[%c3] : memref<7xf32, #tpu.memory_space<smem>>
    %30 = vector.broadcast %29 : f32 to vector<8x8xf32>
    %31 = arith.select %28, %30, %22 : vector<8x8xi1>, vector<8x8xf32>
    %c3_9 = arith.constant 3 : index
    %32 = memref.load %arg5[%c3_9] : memref<7xf32, #tpu.memory_space<smem>>
    %33 = vector.broadcast %32 : f32 to vector<8x8xf32>
    %34 = arith.select %28, %33, %25 : vector<8x8xi1>, vector<8x8xf32>
    %c3_10 = arith.constant 3 : index
    %35 = memref.load %arg3[%c3_10] : memref<6xi32, #tpu.memory_space<smem>>
    %36 = vector.broadcast %35 : i32 to vector<8x8xi32>
    %37 = arith.cmpi eq, %3, %36 : vector<8x8xi32>
    %c4 = arith.constant 4 : index
    %38 = memref.load %arg4[%c4] : memref<7xf32, #tpu.memory_space<smem>>
    %39 = vector.broadcast %38 : f32 to vector<8x8xf32>
    %40 = arith.select %37, %39, %31 : vector<8x8xi1>, vector<8x8xf32>
    %c4_11 = arith.constant 4 : index
    %41 = memref.load %arg5[%c4_11] : memref<7xf32, #tpu.memory_space<smem>>
    %42 = vector.broadcast %41 : f32 to vector<8x8xf32>
    %43 = arith.select %37, %42, %34 : vector<8x8xi1>, vector<8x8xf32>
    %c4_12 = arith.constant 4 : index
    %44 = memref.load %arg3[%c4_12] : memref<6xi32, #tpu.memory_space<smem>>
    %45 = vector.broadcast %44 : i32 to vector<8x8xi32>
    %46 = arith.cmpi eq, %3, %45 : vector<8x8xi32>
    %c5 = arith.constant 5 : index
    %47 = memref.load %arg4[%c5] : memref<7xf32, #tpu.memory_space<smem>>
    %48 = vector.broadcast %47 : f32 to vector<8x8xf32>
    %49 = arith.select %46, %48, %40 : vector<8x8xi1>, vector<8x8xf32>
    %c5_13 = arith.constant 5 : index
    %50 = memref.load %arg5[%c5_13] : memref<7xf32, #tpu.memory_space<smem>>
    %51 = vector.broadcast %50 : f32 to vector<8x8xf32>
    %52 = arith.select %46, %51, %43 : vector<8x8xi1>, vector<8x8xf32>
    %c5_14 = arith.constant 5 : index
    %53 = memref.load %arg3[%c5_14] : memref<6xi32, #tpu.memory_space<smem>>
    %54 = vector.broadcast %53 : i32 to vector<8x8xi32>
    %55 = arith.cmpi eq, %3, %54 : vector<8x8xi32>
    %c6 = arith.constant 6 : index
    %56 = memref.load %arg4[%c6] : memref<7xf32, #tpu.memory_space<smem>>
    %57 = vector.broadcast %56 : f32 to vector<8x8xf32>
    %58 = arith.select %55, %57, %49 : vector<8x8xi1>, vector<8x8xf32>
    %c6_15 = arith.constant 6 : index
    %59 = memref.load %arg5[%c6_15] : memref<7xf32, #tpu.memory_space<smem>>
    %60 = vector.broadcast %59 : f32 to vector<8x8xf32>
    %61 = arith.select %55, %60, %52 : vector<8x8xi1>, vector<8x8xf32>
    %c0_16 = arith.constant 0 : index
    %c0_17 = arith.constant 0 : index
    %62 = vector.load %arg7[%c0_16, %c0_17] : memref<8x1xf32, #tpu.memory_space<vmem>>, vector<8x1xf32>
    %cst = arith.constant dense<0xFF800000> : vector<8xf32>
    %63 = vector.multi_reduction <maximumf>, %61, %cst [1] : vector<8x8xf32> to vector<8xf32>
    %64 = vector.shape_cast %63 : vector<8xf32> to vector<8x1xf32>
    %65 = arith.maximumf %62, %64 : vector<8x1xf32>
    %66 = arith.subf %62, %65 : vector<8x1xf32>
    %67 = math.exp %66 : vector<8x1xf32>
    %68 = vector.broadcast %65 : vector<8x1xf32> to vector<8x8xf32>
    %69 = arith.subf %61, %68 : vector<8x8xf32>
    %70 = math.exp %69 : vector<8x8xf32>
    %c0_18 = arith.constant 0 : index
    %c0_19 = arith.constant 0 : index
    %71 = vector.load %arg8[%c0_18, %c0_19] : memref<8x1xf32, #tpu.memory_space<vmem>>, vector<8x1xf32>
    %72 = arith.mulf %67, %71 : vector<8x1xf32>
    %cst_20 = arith.constant dense<0.000000e+00> : vector<8xf32>
    %73 = vector.multi_reduction <add>, %70, %cst_20 [1] : vector<8x8xf32> to vector<8xf32>
    %74 = vector.shape_cast %73 : vector<8xf32> to vector<8x1xf32>
    %75 = arith.addf %72, %74 : vector<8x1xf32>
    %c0_21 = arith.constant 0 : index
    %c0_22 = arith.constant 0 : index
    %76 = vector.load %arg8[%c0_21, %c0_22] : memref<8x1xf32, #tpu.memory_space<vmem>>, vector<8x1xf32>
    tpu.vector_store %arg8[%c0_21, %c0_22], %75 {strides = array<i32>} : memref<8x1xf32, #tpu.memory_space<vmem>>, vector<8x1xf32>,
    %c0_23 = arith.constant 0 : index
    %c0_24 = arith.constant 0 : index
    %77 = vector.load %arg9[%c0_23, %c0_24] : memref<8x1xf32, #tpu.memory_space<vmem>>, vector<8x1xf32>
    %78 = arith.mulf %67, %77 : vector<8x1xf32>
    %79 = arith.mulf %70, %58 : vector<8x8xf32>
    %cst_25 = arith.constant dense<0.000000e+00> : vector<8xf32>
    %80 = vector.multi_reduction <add>, %79, %cst_25 [1] : vector<8x8xf32> to vector<8xf32>
    %81 = vector.shape_cast %80 : vector<8xf32> to vector<8x1xf32>
    %82 = arith.addf %78, %81 : vector<8x1xf32>
    %c0_26 = arith.constant 0 : index
    %c0_27 = arith.constant 0 : index
    %83 = vector.load %arg9[%c0_26, %c0_27] : memref<8x1xf32, #tpu.memory_space<vmem>>, vector<8x1xf32>
    tpu.vector_store %arg9[%c0_26, %c0_27], %82 {strides = array<i32>} : memref<8x1xf32, #tpu.memory_space<vmem>>, vector<8x1xf32>,
    %c0_28 = arith.constant 0 : index
    %c0_29 = arith.constant 0 : index
    %84 = vector.load %arg7[%c0_28, %c0_29] : memref<8x1xf32, #tpu.memory_space<vmem>>, vector<8x1xf32>
    tpu.vector_store %arg7[%c0_28, %c0_29], %65 {strides = array<i32>} : memref<8x1xf32, #tpu.memory_space<vmem>>, vector<8x1xf32>,
    %c0_i32_30 = arith.constant 0 : i32
    %85 = arith.cmpi eq, %arg1, %c0_i32_30 : i32
    %86 = arith.extui %85 : i1 to i32
    %c0_i32_31 = arith.constant 0 : i32
    %87 = arith.cmpi ne, %86, %c0_i32_31 : i32
    scf.if %87 {
      %c0_32 = arith.constant 0 : index
      %c0_33 = arith.constant 0 : index
      %88 = vector.load %arg9[%c0_32, %c0_33] : memref<8x1xf32, #tpu.memory_space<vmem>>, vector<8x1xf32>
      %c0_34 = arith.constant 0 : index
      %c0_35 = arith.constant 0 : index
      %89 = vector.load %arg8[%c0_34, %c0_35] : memref<8x1xf32, #tpu.memory_space<vmem>>, vector<8x1xf32>
      %90 = tpu.reciprocal %89 {approx = true} : vector<8x1xf32> -> vector<8x1xf32>
      %91 = arith.mulf %88, %90 : vector<8x1xf32>
      %92 = tpu.iota {dimensions = array<i32: 1>} : vector<8x2xi32>
      %c1_i32 = arith.constant 1 : i32
      %93 = vector.broadcast %c1_i32 : i32 to vector<8x2xi32>
      %94 = arith.cmpi eq, %92, %93 : vector<8x2xi32>
      %cst_36 = arith.constant 0.000000e+00 : f32
      %95 = vector.shape_cast %91 : vector<8x1xf32> to vector<8x1xf32>
      %96 = vector.broadcast %95 : vector<8x1xf32> to vector<8x2xf32>
      %97 = vector.broadcast %cst_36 : f32 to vector<8x2xf32>
      %98 = arith.select %94, %96, %97 : vector<8x2xi1>, vector<8x2xf32>
      %c0_37 = arith.constant 0 : index
      %c0_38 = arith.constant 0 : index
      %99 = vector.load %arg6[%c0_37, %c0_38] : memref<8x2xf32, #tpu.memory_space<vmem>>, vector<8x2xf32>
      tpu.vector_store %arg6[%c0_37, %c0_38], %98 {strides = array<i32>} : memref<8x2xf32, #tpu.memory_space<vmem>>, vector<8x2xf32>,
    } else {
    }
    return
  }
  func.func @transform_0(%arg0: i32, %arg1: i32) -> (i32, i32) {
    %c0_i32 = arith.constant 0 : i32
    return %arg0, %arg1 : i32, i32
  }
  func.func @transform_1(%arg0: i32, %arg1: i32) -> i32 {
    %c0_i32 = arith.constant 0 : i32
    %c0_i32_0 = arith.constant 0 : i32
    return %c0_i32 : i32
  }
  func.func @transform_2(%arg0: i32, %arg1: i32) -> i32 {
    %c0_i32 = arith.constant 0 : i32
    %c0_i32_0 = arith.constant 0 : i32
    return %c0_i32 : i32
  }
  func.func @transform_3(%arg0: i32, %arg1: i32) -> i32 {
    %c0_i32 = arith.constant 0 : i32
    %c0_i32_0 = arith.constant 0 : i32
    return %c0_i32 : i32
  }
  func.func @transform_4(%arg0: i32, %arg1: i32) -> (i32, i32) {
    %c0_i32 = arith.constant 0 : i32
    %c0_i32_0 = arith.constant 0 : i32
    return %arg0, %c0_i32 : i32, i32
  }
}

</mosaic_0001>

<bundles_post_ra>
// kernel: tpu_custom_call.1
= control target key start
LH: loop header
LB: loop body
LE: loop exit
PB: predicated region body
PF: predicated region fallthrough
CT: control target
= control target key end

     0   :  { %9 = vsyncpa [#allocation6], 0  ;;  %s389_s0 = inlined_call_operand.hbm [shape: s32[8,8], index: 0, kind: input, shape index: {}]   ;;  %s390_s1 = inlined_call_operand.vmem [shape: s32[6], index: 1, kind: input, shape index: {}]   ;;  %s391_s2 = inlined_call_operand.vmem [shape: f32[7], index: 2, kind: input, shape index: {}]   ;;  %s392_s3 = inlined_call_operand.vmem [shape: f32[7], index: 3, kind: input, shape index: {}]   ;;  %s393_s4 = inlined_call_operand.vmem [shape: f32[8,2], index: 4, kind: output, shape index: {}]  }
   0x1   :  { %10 = vsyncpa [#allocation7], 0 }
   0x2   :  { %11 = vsyncpa [#allocation10], 0  ;;  %s38_s17 = sshll.u32 %s391_s2, 4  ;;  %s39_s17 = int_to_ptr.vmem [resolvable:$true] %s38_s17 }
   0x3   :  { %s223_s18 = scalar_lea.vmem %s39_s17, 16  ;;  %p228_p1 = scmp.lt.s32.totalorder %s39_s17, %s39_s17 }
   0x4   :  { %p224_p0 = scmp.ne.s32.totalorder %s39_s17, %s223_s18  ;;  %p229_p2 = scmp.lt.s32.totalorder %s223_s18, %s223_s18 }
   0x6   :  { %p230_p3 = por %p229_p2, %p228_p1 }
   0x8   :  { %p231_p4 = pnand %p230_p3, %p224_p0 }
   0xa   :  { %234 = shalt.err (!%p231_p4)
}
   0xb   :  { %s285_s19 = smov [#allocation9]   ;;  %s286_s20 = smov [#allocation5]  }
   0xc   :  { %41 = dma.vmem_to_smem %s39_s17, 16, %s285_s19, [#allocation10]  }
   0xd   :  { %s18_s21 = sshll.u32 %s286_s20, 4  ;;  %s28_s24 = sshll.u32 %s390_s1, 4  ;;  %s19_s21 = int_to_ptr.vmem [resolvable:$true] %s18_s21  ;;  %s29_s24 = int_to_ptr.vmem [resolvable:$true] %s28_s24 }
   0xe   :  { %s243_s25 = scalar_lea.vmem %s19_s21, 128  ;;  %p248_p6 = scmp.lt.s32.totalorder %s19_s21, %s19_s21 }
   0xf   :  { %p244_p5 = scmp.ne.s32.totalorder %s19_s21, %s243_s25  ;;  %p249_p7 = scmp.lt.s32.totalorder %s243_s25, %s243_s25 }
  0x11   :  { %p250_p8 = por %p249_p7, %p248_p6 }
  0x13   :  { %p251_p9 = pnand %p250_p8, %p244_p5 }
  0x15   :  { %254 = shalt.err (!%p251_p9)
}
  0x16   :  { %21 = dma.hbm_to_vmem [thread:$0]  %s389_s0, 128, %s19_s21, [#allocation6]  }
  0x17   :  { %s48_s29 = sshll.u32 %s392_s3, 4  ;;  %s255_s30 = scalar_lea.vmem %s29_s24, 16  ;;  %s49_s29 = int_to_ptr.vmem [resolvable:$true] %s48_s29 }
  0x18   :  { %p256_p10 = scmp.ne.s32.totalorder %s29_s24, %s255_s30  ;;  %p260_p11 = scmp.lt.s32.totalorder %s29_s24, %s29_s24 }
  0x19   :  { %p261_p12 = scmp.lt.s32.totalorder %s255_s30, %s255_s30 }
  0x1b   :  { %p262_p13 = por %p261_p12, %p260_p11 }
  0x1d   :  { %p263_p0 = pnand %p262_p13, %p256_p10 }
  0x1f   :  { %266 = shalt.err (!%p263_p0)
}
  0x20   :  { %s287_s1 = smov [#allocation8]   ;;  %s267_s5 = scalar_lea.vmem %s49_s29, 16 }
  0x21   :  { %31 = dma.vmem_to_smem %s29_s24, 16, %s287_s1, [#allocation7]  }
  0x22   :  { %p268_p1 = scmp.ne.s32.totalorder %s49_s29, %s267_s5  ;;  %p272_p2 = scmp.lt.s32.totalorder %s49_s29, %s49_s29 }
  0x23   :  { %p273_p3 = scmp.lt.s32.totalorder %s267_s5, %s267_s5 }
  0x25   :  { %p274_p4 = por %p273_p3, %p272_p2 }
  0x27   :  { %p275_p5 = pnand %p274_p4, %p268_p1 }
  0x29   :  { %278 = shalt.err (!%p275_p5)
}
  0x2a   :  { %s288_s0 = smov [#allocation11]  }
  0x2b   :  { %51 = dma.vmem_to_smem %s49_s29, 16, %s288_s0, [#allocation10]  }
  0x2c   :  { %279 = dma.done.wait [#allocation6], 128  }
  0x2d   :  { %280 = vsyncadd [#allocation6], 4294967168 }
  0x2e   :  { %281 = dma.done.wait [#allocation7], 16  }
  0x2f   :  { %282 = vsyncadd [#allocation7], 4294967280 }
  0x30   :  { %283 = dma.done.wait [#allocation10], 32  }
  0x31   :  { %284 = vsyncadd [#allocation10], 4294967264 }
  0x32   :  { %64 = sfence }
  0x33   :  { %s76_s3 = sld [smem:[#allocation11]]  ;;  %v73_v0 = vld [vmem:[#allocation5] sm:$0xff]  ;;  %vm133_vm5 = vcmask 64512   ;;  %vm69_vm7 = vcmask 7168   ;;  %v289_v27 = vmov -inf   ;;  %v290_v28 = vmov 0  }
  0x34   :  { %s78_s6 = sld [smem:[#allocation8]]  ;;  %70 = vst.msk [vmem:[#allocation2] sm:$0xff] %vm69_vm7, %v289_v27  ;;  %215 = vset.pattern.permute.xlu0 %v290_v28  ;;  %216 = vset.pattern.permute.xlu1 %v290_v28  ;;  %v291_v29 = vmov 0.0   ;;  %vm182_vm9 = vcmask 15360  }
  0x35   :  { %s192_s7 = sld [smem:[#allocation11 + $0x1]]  ;;  %71 = vst.msk [vmem:[#allocation3] sm:$0xff] %vm69_vm7, %v291_v29  ;;  %72 = vst.msk [vmem:[#allocation4] sm:$0xff] %vm69_vm7, %v291_v29 }
  0x36   :  { %s193_s8 = sld [smem:[#allocation8 + $0x1]] }
  0x37   :  { %s195_s9 = sld [smem:[#allocation11 + $0x2]] }
  0x38   :  { %s196_s10 = sld [smem:[#allocation8 + $0x2]] }
  0x39   :  { %v77_v1 = vstv %s76_s3  ;;  %s198_s11 = sld [smem:[#allocation11 + $0x3]] }
  0x3a   :  { %v79_v2 = vstv %s78_s6  ;;  %s199_s12 = sld [smem:[#allocation8 + $0x3]] }
  0x3b   :  { %vm329_vm0 = vcmp.eq.s32.totalorder %v73_v0, %v79_v2  ;;  %v85_v4 = vstv %s192_s7  ;;  %s201_s13 = sld [smem:[#allocation11 + $0x4]]  ;;  %v132_v30 = vld [vmem:[#allocation2] sm:$0xff] }
  0x3c   :  { %v86_v5 = vsel %vm329_vm0, %v85_v4, %v77_v1  ;;  %v88_v6 = vstv %s193_s8  ;;  %s202_s14 = sld [smem:[#allocation8 + $0x4]]  ;;  %v149_v56 = vld [vmem:[#allocation3] sm:$0xff]  ;;  %v157_v59 = vld [vmem:[#allocation4] sm:$0xff]  ;;  %v173_v4 = vlaneseq }
  0x3d   :  { %vm335_vm1 = vcmp.eq.s32.totalorder %v73_v0, %v88_v6  ;;  %v94_v8 = vstv %s195_s9  ;;  %s204_s15 = sld [smem:[#allocation11 + $0x5]] }
  0x3e   :  { %v95_v9 = vsel %vm335_vm1, %v94_v8, %v86_v5  ;;  %v97_v10 = vstv %s196_s10  ;;  %s205_s16 = sld [smem:[#allocation8 + $0x5]]  ;;  %v174_v5 = vand.u32 127, %v173_v4 }
  0x3f   :  { %vm341_vm2 = vcmp.eq.s32.totalorder %v73_v0, %v97_v10  ;;  %v103_v12 = vstv %s198_s11  ;;  %s207_s17 = sld [smem:[#allocation11 + $0x6]] }
  0x40   :  { %v104_v13 = vsel %vm341_vm2, %v103_v12, %v95_v9  ;;  %v106_v14 = vstv %s199_s12  ;;  %s74_s18 = sld [smem:[#allocation9]]  ;;  %vm175_vm8 = vcmp.eq.s32.totalorder %v174_v5, 1 }
  0x41   :  { %vm347_vm3 = vcmp.eq.s32.totalorder %v73_v0, %v106_v14  ;;  %v112_v16 = vstv %s201_s13  ;;  %s191_s19 = sld [smem:[#allocation9 + $0x1]] }
  0x42   :  { %v113_v17 = vsel %vm347_vm3, %v112_v16, %v104_v13  ;;  %v115_v18 = vstv %s202_s14  ;;  %s194_s20 = sld [smem:[#allocation9 + $0x2]] }
  0x43   :  { %vm353_vm4 = vcmp.eq.s32.totalorder %v73_v0, %v115_v18  ;;  %v121_v20 = vstv %s204_s15  ;;  %s197_s21 = sld [smem:[#allocation9 + $0x3]] }
  0x44   :  { %v122_v21 = vsel %vm353_vm4, %v121_v20, %v113_v17  ;;  %v124_v22 = vstv %s205_s16  ;;  %s200_s22 = sld [smem:[#allocation9 + $0x4]] }
  0x45   :  { %vm359_vm6 = vcmp.eq.s32.totalorder %v73_v0, %v124_v22  ;;  %v130_v24 = vstv %s207_s17  ;;  %s203_s23 = sld [smem:[#allocation9 + $0x5]] }
  0x46   :  { %v131_v25 = vsel %vm359_vm6, %v130_v24, %v122_v21  ;;  %v75_v34 = vstv %s74_s18  ;;  %s206_s24 = sld [smem:[#allocation9 + $0x6]] }
  0x47   :  { %v134_v26 = vsel %vm133_vm5, %v131_v25, -inf  ;;  %v82_v35 = vstv %s191_s19 }
  0x48   :  { %135 = vmax.xlane.f32.xlu0 %v134_v26  ;;  %v83_v38 = vsel %vm329_vm0, %v82_v35, %v75_v34  ;;  %v91_v39 = vstv %s194_s20 }
  0x49   :  { %v92_v41 = vsel %vm335_vm1, %v91_v39, %v83_v38  ;;  %v100_v42 = vstv %s197_s21 }
  0x4a   :  { %v101_v43 = vsel %vm341_vm2, %v100_v42, %v92_v41  ;;  %v109_v44 = vstv %s200_s22 }
  0x4b   :  { %v110_v45 = vsel %vm347_vm3, %v109_v44, %v101_v43  ;;  %v118_v46 = vstv %s203_s23 }
  0x4c   :  { %v119_v47 = vsel %vm353_vm4, %v118_v46, %v110_v45  ;;  %v127_v48 = vstv %s206_s24 }
  0x4d   :  { %v128_v49 = vsel %vm359_vm6, %v127_v48, %v119_v47 }
  0xd1   :  { %v136_v31 = vpop.xlane.xlu0 %135 }
  0xd2   :  { %v137_v32 = vmax.f32 %v132_v30, %v136_v31 }
  0xd4   :  { %v138_v33 = vsub.f32 %v132_v30, %v137_v32  ;;  %165 = vst.msk [vmem:[#allocation2] sm:$0xff] %vm69_vm7, %v137_v32  ;;  %143 = vperm.xlu0 %215, %v137_v32  }
  0xd6   :  { %v139_v54 = vmul.f32 1.442695, %v138_v33 }
 0x14f   :  { %v144_v36 = vpop.permute.xlu0 %143 }
 0x150   :  { %v146_v37 = vsub.f32 %v131_v25, %v144_v36 }
 0x152   :  { %v147_v40 = vmul.f32 1.442695, %v146_v37 }
 0x154   :  { %217 = vpow2.f32 %v147_v40 }
 0x155   :  { %219 = vpow2.f32 %v139_v54 }
 0x161   :  { %v218_v50 = vpop.eup %217 }
 0x162   :  { %v151_v51 = vsel %vm133_vm5, %v218_v50, 0.0  ;;  %v159_v52 = vmul.f32 %v218_v50, %v128_v49  ;;  %v220_v55 = vpop.eup %219 }
 0x163   :  { %152 = vadd.xlane.f32.xlu1 %v151_v51  ;;  %v150_v57 = vmul.f32 %v220_v55, %v149_v56  ;;  %v158_v61 = vmul.f32 %v220_v55, %v157_v59 }
 0x164   :  { %v160_v53 = vsel %vm133_vm5, %v159_v52, 0.0 }
 0x167   :  { %161 = vadd.xlane.f32.xlu1 %v160_v53 }
 0x1ec   :  { %v153_v58 = vpop.xlane.xlu1 %152 }
 0x1ed   :  { %v154_v60 = vadd.f32 %v153_v58, %v150_v57 }
 0x1ef   :  { %156 = vst.msk [vmem:[#allocation3] sm:$0xff] %vm69_vm7, %v154_v60 }
 0x1f0   :  { %v162_v62 = vpop.xlane.xlu1 %161 }
 0x1f1   :  { %v163_v63 = vadd.f32 %v162_v62, %v158_v61 }
 0x1f3   :  { %164 = vst.msk [vmem:[#allocation4] sm:$0xff] %vm69_vm7, %v163_v63 }
 0x1f6   :  { %v170_v0 = vld [vmem:[#allocation3] sm:$0xff] }
 0x1f7   :  { %221 = vrcp.f32 %v170_v0 }
 0x1fa   :  { %v169_v2 = vld [vmem:[#allocation4] sm:$0xff] }
 0x204   :  { %v222_v1 = vpop.eup %221 }
 0x205   :  { %v172_v3 = vmul.f32 %v222_v1, %v169_v2 }
 0x207   :  { %178 = vperm.xlu1 %216, %v172_v3  }
 0x282   :  { %v179_v6 = vpop.permute.xlu1 %178 }
 0x283   :  { %v181_v7 = vsel %vm175_vm8, %v179_v6, 0.0 }
 0x284   :  { %183 = vst.msk [vmem:[%s393_s4] sm:$0xff] %vm182_vm9, %v181_v7 }
 0x285   :  { %188 = vsyncpa [#allocation6], 1 }
 0x286   :  { %189 = vsyncpa [#allocation7], 1 }
 0x287   :  { %190 = vsyncpa [#allocation10], 1 }

</bundles_post_ra>
